<compile_context>
chip_gen: v5e
topology: v5e:2x2
jax: 0.10.0
libtpu: 0.0.40
codegen_flags: <defaults>
</compile_context>

<pallas_src>
import jax
import jax.numpy as jnp
from jax.experimental import pallas as pl
from jax.experimental.pallas import tpu as pltpu

MIB = 1024 * 1024


def _round_up(x: int, m: int) -> int:
    return (x + m - 1) // m * m


def _mm_kernel(a_ref, b_ref, o_ref):
    """One (tm, tn) output tile; K is the last ('arbitrary') grid axis.

    The output BlockSpec maps every k to the same (i, j) block, so o_ref stays
    resident in VMEM across the K loop and doubles as the f32 accumulator."""
    @pl.when(pl.program_id(2) == 0)
    def _init():
        o_ref[...] = jnp.zeros_like(o_ref)

    o_ref[...] += jnp.dot(a_ref[...], b_ref[...],
                          preferred_element_type=jnp.float32)


def _default_config(use_bf16: bool):
    """Generation-aware (tm, tn, tk, vmem_limit_bytes) defaults."""
    try:
        kind = jax.devices()[0].device_kind.lower()
    except Exception:  # pragma: no cover - defensive
        kind = ""
    is_v5e = ("v5 lite" in kind) or ("v5e" in kind) or ("v5lite" in kind)
    is_v6 = "v6" in kind
    if is_v5e:
        # v5e: ~240 FLOP/byte roofline -> 512x512 tiles suffice; scoped VMEM
        # default is only 16 MiB, so raise it.
        return 512, 512, 1024, 64 * MIB
    if is_v6:
        # v6e: 128 MiB VMEM; needs high arithmetic intensity for bf16 peak.
        if use_bf16:
            return 2048, 1024, 1024, 100 * MIB
        return 1024, 1024, 1024, 100 * MIB
    # v7x (and unknown, conservative): 64 MiB VMEM per TensorCore -> keep the
    # double-buffered working set well under ~48 MiB.
    if use_bf16:
        return 2048, 1024, 1024, 48 * MIB  # ~28 MiB working set
    return 1024, 1024, 1024, 48 * MIB      # ~24 MiB working set


def _clamp_tile(default: int, dim: int, align: int) -> int:
    """Largest legal tile <= default for this dim (never exceeds the dim)."""
    if dim <= align:
        return dim                      # full (small) dim is always a legal tile
    return min(default, (dim // align) * align)


def _pick_tk(K: int, tk_default: int):
    """Choose tk and padded K. Prefer a 128-multiple tk dividing K (no pad)."""
    if K <= 128:
        return K, K                     # single K step, no padding needed
    if K % 128 == 0:
        start = (min(tk_default, K) // 128) * 128
        for cand in range(start, 127, -128):
            if K % cand == 0:
                return cand, K          # divides K exactly -> no padding
    tk = min(tk_default, _round_up(K, 128))
    return tk, _round_up(K, tk)
    # TODO(synk): for very large misaligned K, mask the K tail in-kernel with a
    # broadcasted_iota instead of the jnp.pad HBM round-trip.


def matmul2d(lhs: jax.Array, rhs: jax.Array, *,
             tm: int | None = None, tn: int | None = None, tk: int | None = None,
             use_bf16: bool = False) -> jax.Array:
    """2-D matmul (M, K) @ (K, N) -> (M, N) f32 via a tiled Pallas TPU kernel.

    use_bf16=True is the fast path (MXU bf16 operands, f32 accumulation); it
    trades bit-faithfulness to a float32 reference (~1e-2 rel tolerance).
    """
    assert lhs.ndim == 2 and rhs.ndim == 2, "Matmul2D expects 2-D operands"
    M, K = lhs.shape
    K2, N = rhs.shape
    assert K == K2, "incompatible shapes for 2-D matmul"

    tm_d, tn_d, tk_d, vmem_limit = _default_config(use_bf16)
    tm = tm_d if tm is None else tm
    tn = tn_d if tn is None else tn
    tk = tk_d if tk is None else tk

    # bf16 fast path: cast ONCE in the wrapper (halves HBM/VMEM traffic for
    # every re-read tile and removes the per-(i,j,k) VPU cast).
    in_dtype = jnp.bfloat16 if use_bf16 else jnp.float32
    lhs_c = lhs if lhs.dtype == in_dtype else lhs.astype(in_dtype)
    rhs_c = rhs if rhs.dtype == in_dtype else rhs.astype(in_dtype)

    # Clamp tiles for small problems while keeping legal TPU tile shapes:
    #   lhs block (tm, tk): sublane tm (8/16-mult or full), lane tk (128-mult or full)
    #   rhs block (tk, tn): sublane tk,                     lane tn (128-mult or full)
    sub = 16 if use_bf16 else 8           # bf16 packs 2 rows per sublane
    tm = _clamp_tile(tm, M, sub)
    tn = _clamp_tile(tn, N, 128)
    tk, Kp = _pick_tk(K, tk)

    # Only the contraction dim needs zero padding for correctness: ragged M/N
    # edge blocks only pollute output rows/cols that Pallas masks on writeback,
    # but garbage along K would contaminate valid outputs.
    if Kp != K:
        lhs_c = jnp.pad(lhs_c, ((0, 0), (0, Kp - K)))
        rhs_c = jnp.pad(rhs_c, ((0, Kp - K), (0, 0)))

    gm, gn, gk = pl.cdiv(M, tm), pl.cdiv(N, tn), Kp // tk
    elem = 2 if use_bf16 else 4

    return pl.pallas_call(
        _mm_kernel,
        out_shape=jax.ShapeDtypeStruct((M, N), jnp.float32),
        grid_spec=pltpu.PrefetchScalarGridSpec(
            num_scalar_prefetch=0,
            grid=(gm, gn, gk),
            in_specs=[
                pl.BlockSpec((tm, tk), lambda i, j, k: (i, k)),
                pl.BlockSpec((tk, tn), lambda i, j, k: (k, j)),
            ],
            out_specs=pl.BlockSpec((tm, tn), lambda i, j, k: (i, j)),
        ),
        compiler_params=pltpu.CompilerParams(
            dimension_semantics=("parallel", "parallel", "arbitrary"),
            vmem_limit_bytes=vmem_limit,
        ),
        cost_estimate=pl.CostEstimate(
            flops=2 * M * N * Kp,
            transcendentals=0,
            # Account for A/B re-reads across the output tile grid.
            bytes_accessed=elem * (M * Kp * gn + Kp * N * gm) + 4 * M * N,
        ),
    )(lhs_c, rhs_c)


if __name__ == "__main__":
    key = jax.random.PRNGKey(0)
    k1, k2, k3, k4 = jax.random.split(key, 4)

    # Small shapes consistent with the Matmul2D e2e test regime.
    M, K, N = 8, 32, 16
    lhs = jax.random.normal(k1, (M, K), dtype=jnp.float32)
    rhs = jax.random.normal(k2, (K, N), dtype=jnp.float32)

    out = matmul2d(lhs, rhs)
    jax.block_until_ready(out)
    ref = jnp.matmul(lhs, rhs)
    assert out.shape == (M, N)
    assert jnp.allclose(out, ref, atol=1e-4, rtol=1e-4)

    # Misaligned shapes: exercise ragged M/N edge blocks + K-only zero padding.
    M2, K2_, N2 = 200, 200, 130
    lhs2 = jax.random.normal(k3, (M2, K2_), dtype=jnp.float32)
    rhs2 = jax.random.normal(k4, (K2_, N2), dtype=jnp.float32)

    out2 = matmul2d(lhs2, rhs2)
    jax.block_until_ready(out2)
    ref2 = jnp.matmul(lhs2, rhs2)
    assert out2.shape == (M2, N2)
    assert jnp.allclose(out2, ref2, atol=1e-3, rtol=1e-3)

    # bf16 fast path (non-bit-exact by design; f32 accumulation on the MXU).
    out3 = matmul2d(lhs2, rhs2, use_bf16=True)
    jax.block_until_ready(out3)
    assert jnp.allclose(out3, ref2, atol=3e-1, rtol=2e-2)

    print("KERNEL_OK")
</pallas_src>

<mosaic_0001>
module attributes {stable_mosaic.version = 11 : i64} {
  func.func @_mm_kernel(%arg0: i32, %arg1: i32, %arg2: i32, %arg3: memref<8x32xf32, #tpu.memory_space<vmem>>, %arg4: memref<32x16xf32, #tpu.memory_space<vmem>>, %arg5: memref<8x16xf32, #tpu.memory_space<vmem>>) attributes {dimension_semantics = [#tpu.dimension_semantics<parallel>, #tpu.dimension_semantics<parallel>, #tpu.dimension_semantics<arbitrary>], iteration_bounds = array<i64: 1, 1, 1>, scalar_prefetch = 0 : i64, scratch_operands = 0 : i64, tpu.core_type = #tpu.core_type<tc>, window_params = [{transform_indices = @transform_0, window_bounds = array<i64: 8, 32>}, {transform_indices = @transform_1, window_bounds = array<i64: 32, 16>}, {transform_indices = @transform_2, window_bounds = array<i64: 8, 16>}]} {
    %c0_i32 = arith.constant 0 : i32
    %0 = arith.cmpi eq, %arg2, %c0_i32 : i32
    %1 = arith.extui %0 : i1 to i32
    %c0_i32_0 = arith.constant 0 : i32
    %2 = arith.cmpi ne, %1, %c0_i32_0 : i32
    scf.if %2 {
      %cst_8 = arith.constant 0.000000e+00 : f32
      %9 = vector.broadcast %cst_8 : f32 to vector<8x16xf32>
      %c0_9 = arith.constant 0 : index
      %c0_10 = arith.constant 0 : index
      %10 = vector.load %arg5[%c0_9, %c0_10] : memref<8x16xf32, #tpu.memory_space<vmem>>, vector<8x16xf32>
      tpu.vector_store %arg5[%c0_9, %c0_10], %9 {strides = array<i32>} : memref<8x16xf32, #tpu.memory_space<vmem>>, vector<8x16xf32>,
    } else {
    }
    %c0 = arith.constant 0 : index
    %c0_1 = arith.constant 0 : index
    %3 = vector.load %arg5[%c0, %c0_1] : memref<8x16xf32, #tpu.memory_space<vmem>>, vector<8x16xf32>
    %c0_2 = arith.constant 0 : index
    %c0_3 = arith.constant 0 : index
    %4 = vector.load %arg3[%c0_2, %c0_3] : memref<8x32xf32, #tpu.memory_space<vmem>>, vector<8x32xf32>
    %c0_4 = arith.constant 0 : index
    %c0_5 = arith.constant 0 : index
    %5 = vector.load %arg4[%c0_4, %c0_5] : memref<32x16xf32, #tpu.memory_space<vmem>>, vector<32x16xf32>
    %cst = arith.constant dense<0.000000e+00> : vector<8x16xf32>
    %6 = tpu.matmul %4, %5, %cst {dimension_numbers = #tpu.dot_dimension_numbers<[1], [0], [0], [1], [0, 0, 1, 1], [], []>} : vector<8x32xf32>, vector<32x16xf32>, vector<8x16xf32> -> vector<8x16xf32>
    %7 = arith.addf %3, %6 : vector<8x16xf32>
    %c0_6 = arith.constant 0 : index
    %c0_7 = arith.constant 0 : index
    %8 = vector.load %arg5[%c0_6, %c0_7] : memref<8x16xf32, #tpu.memory_space<vmem>>, vector<8x16xf32>
    tpu.vector_store %arg5[%c0_6, %c0_7], %7 {strides = array<i32>} : memref<8x16xf32, #tpu.memory_space<vmem>>, vector<8x16xf32>,
    return
  }
  func.func @transform_0(%arg0: i32, %arg1: i32, %arg2: i32) -> (i32, i32) {
    %c0_i32 = arith.constant 0 : i32
    return %arg0, %arg2 : i32, i32
  }
  func.func @transform_1(%arg0: i32, %arg1: i32, %arg2: i32) -> (i32, i32) {
    %c0_i32 = arith.constant 0 : i32
    return %arg2, %arg1 : i32, i32
  }
  func.func @transform_2(%arg0: i32, %arg1: i32, %arg2: i32) -> (i32, i32) {
    %c0_i32 = arith.constant 0 : i32
    return %arg0, %arg1 : i32, i32
  }
}

</mosaic_0001>

<bundles_post_ra>
// kernel: tpu_custom_call.1
= control target key start
LH: loop header
LB: loop body
LE: loop exit
PB: predicated region body
PF: predicated region fallthrough
CT: control target
= control target key end

     0   :  { %vm16_vm0 = vcmask 130048   ;;  %v96_v2 = vmov 0.0   ;;  %s133_s0 = inlined_call_operand.vmem [shape: f32[8,32], index: 0, kind: input, shape index: {}]   ;;  %s134_s1 = inlined_call_operand.vmem [shape: f32[32,16], index: 1, kind: input, shape index: {}]   ;;  %s135_s2 = inlined_call_operand.hbm [shape: f32[8,16], index: 2, kind: output, shape index: {}]  }
   0x1   :  { %v23_v0 = vld [vmem:[%s134_s1 + $0x18] sm:$0xff]  ;;  %v22_v1 = vld [vmem:[%s134_s1 + $0x10] sm:$0xff]  ;;  %17 = vst.msk [vmem:[#allocation2] sm:$0xff] %vm16_vm0, %v96_v2 }
   0x2   :  { %40 = vmatpush.msra.mxu0 %v23_v0 }
   0x3   :  { %7 = vsyncpa [#allocation3], 0  ;;  %v21_v3 = vld [vmem:[%s134_s1 + $0x8] sm:$0xff]  ;;  %v20_v4 = vld [vmem:[%s134_s1] sm:$0xff]  ;;  %vm24_vm1 = vcmask 261120   ;;  %s97_s19 = smov [#allocation2]  }
   0x4   :  { %41 = vmatpush.msra.mxu0 %v22_v1  ;;  %v19_v5 = vld [vmem:[%s133_s0] sm:$0xff]  ;;  %s56_s20 = sshll.u32 %s97_s19, 4  ;;  %s58_s23 = sshll.u32 %s135_s2, 4  ;;  %s57_s20 = int_to_ptr.vmem [resolvable:$true] %s56_s20  ;;  %s59_s23 = int_to_ptr.hbm [resolvable:$true] %s58_s23 }
   0x6   :  { %42 = vmatpush.msra.mxu0 %v21_v3 }
   0x8   :  { %43 = vmatpush.msra.mxu0 %v20_v4  ;;  %v18_v6 = vld [vmem:[#allocation2] sm:$0xff] }
   0x9   :  { %67 = vmatmul.msk.f32.vlgmr.msra.gmra.mxu0 %vm24_vm1, %v19_v5 }
  0x86   :  { %v45_v7 = vpop.f32.mrf.mxu0 }
  0x87   :  { %v48_v8 = vadd.f32 %v45_v7, %v18_v6 }
  0x89   :  { %50 = vst.msk [vmem:[#allocation2] sm:$0xff] %vm16_vm0, %v48_v8 }
  0x8a   :  { %61 = dma.vmem_to_hbm [thread:$0]  %s57_s20, 128, %s59_s23, [#allocation3]  }
  0x8b   :  { %94 = dma.done.wait [#allocation3], 128  }
  0x8c   :  { %95 = vsyncadd [#allocation3], 4294967168 }
  0x8d   :  { %66 = vsyncpa [#allocation3], 1 }

</bundles_post_ra>
